<compile_context>
chip_gen: v7x
topology: tpu7x:2x2x1
jax: 0.10.0
libtpu: 0.0.40
codegen_flags: <defaults>
</compile_context>

<pallas_src>
import math

import jax
import jax.numpy as jnp
from jax.experimental import pallas as pl
from jax.experimental.pallas import tpu as pltpu


def _round_up(x, m):
    return ((x + m - 1) // m) * m


def nn_new_kernel(inp_ref, w1_ref, b1_ref, w2_ref, b2_ref,
                  w3_ref, b3_ref, w4_ref, b4_ref, out_ref):
    inp = inp_ref[...].astype(jnp.float32)            # (3, tn)
    x0 = inp[0:1, :]                                  # sublane row reads
    x1 = inp[1:2, :]
    t = inp[2:3, :]

    # torch.sort(dim=1) on a 2-element row: ascending, stable on ties.
    swap = x0 > x1                                    # (1, tn) bool
    x_lo = jnp.minimum(x0, x1)
    x_hi = jnp.maximum(x0, x1)
    h = jnp.concatenate([x_lo, x_hi, t], axis=0)      # (3, tn) sublane build

    # Hoist bias reads; (out, 1) biases broadcast across lanes for free.
    b1 = b1_ref[...]
    b2 = b2_ref[...]
    b3 = b3_ref[...]
    b4 = b4_ref[...]

    # start: Linear(3 -> hid) + tanh          h1: (hid, tn)
    h1 = jnp.tanh(
        jnp.dot(w1_ref[...], h, preferred_element_type=jnp.float32) + b1)

    # middle: skip_embed = tanh(Linear) -> tanh(Linear) -> + skip
    e = jnp.tanh(
        jnp.dot(w2_ref[...], h1, preferred_element_type=jnp.float32) + b2)
    e = jnp.tanh(
        jnp.dot(w3_ref[...], e, preferred_element_type=jnp.float32) + b3)
    h2 = e + h1

    # out: tanh + Linear(hid -> 2)            o: (2, tn)
    o = jnp.dot(w4_ref[...], jnp.tanh(h2),
                preferred_element_type=jnp.float32) + b4

    # take_along_dim(out, idx_sorted, 1): undo the 2-element sort permutation
    # with full-vreg sublane selects.
    o0 = o[0:1, :]
    o1 = o[1:2, :]
    r0 = jnp.where(swap, o1, o0)
    r1 = jnp.where(swap, o0, o1)
    out_ref[...] = jnp.concatenate([r0, r1], axis=0).astype(out_ref.dtype)


def nn_new_forward(inp, params, *, tile_n=2048):
    """inp: (N, 3) = [x0, x1, t]; returns (N, 2)."""
    N, F = inp.shape
    assert F == 3, "NN_new expects input columns [x0, x1, t]"
    w1, b1, w2, b2, w3, b3, w4, b4 = params
    out_dim = w4.shape[0]

    # Lane tile must be a multiple of 128; use a single block for small N.
    tile = min(_round_up(max(tile_n, 128), 128), _round_up(N, 128))
    n_pad = _round_up(N, tile)

    inp_t = jnp.transpose(inp).astype(jnp.float32)     # (3, N), batch on lanes
    if n_pad != N:
        inp_t = jnp.pad(inp_t, ((0, 0), (0, n_pad - N)))

    def full_spec(a):
        return pl.BlockSpec(a.shape, lambda i: (0, 0))

    out_t = pl.pallas_call(
        nn_new_kernel,
        out_shape=jax.ShapeDtypeStruct((out_dim, n_pad), inp.dtype),
        grid_spec=pltpu.PrefetchScalarGridSpec(
            num_scalar_prefetch=0,
            grid=(n_pad // tile,),
            in_specs=[
                pl.BlockSpec((3, tile), lambda i: (0, i)),
                full_spec(w1), full_spec(b1),
                full_spec(w2), full_spec(b2),
                full_spec(w3), full_spec(b3),
                full_spec(w4), full_spec(b4),
            ],
            out_specs=pl.BlockSpec((out_dim, tile), lambda i: (0, i)),
        ),
        compiler_params=pltpu.CompilerParams(
            dimension_semantics=("parallel",),
            vmem_limit_bytes=64 << 20),
    )(inp_t, w1, b1, w2, b2, w3, b3, w4, b4)

    return jnp.transpose(out_t)[:N]                    # (N, 2)


def init_params(key, input_dim=3, hid_dim=32, output_dim=2, dtype=jnp.float32):
    """PyTorch-Linear-style uniform init.
    Weights stored (out, in) (PyTorch native layout) so the kernel does W @ x + b."""
    ks = jax.random.split(key, 8)

    def lin(kw, kb, fan_in, fan_out):
        bound = 1.0 / math.sqrt(fan_in)
        w = jax.random.uniform(kw, (fan_out, fan_in), dtype, -bound, bound)
        b = jax.random.uniform(kb, (fan_out, 1), dtype, -bound, bound)
        return w, b

    w1, b1 = lin(ks[0], ks[1], input_dim, hid_dim)     # start
    w2, b2 = lin(ks[2], ks[3], hid_dim, hid_dim)       # middle.embed[0]
    w3, b3 = lin(ks[4], ks[5], hid_dim, hid_dim)       # middle.embed[2]
    w4, b4 = lin(ks[6], ks[7], hid_dim, output_dim)    # out[1]
    return (w1, b1, w2, b2, w3, b3, w4, b4)


def reference_forward(inp, params):
    """Pure-JAX reference mirroring the PyTorch module (batch-major)."""
    w1, b1, w2, b2, w3, b3, w4, b4 = params
    hp = jax.lax.Precision.HIGHEST
    x = inp[:, :2]
    t = inp[:, 2:3]
    idx = jnp.argsort(x, axis=1)
    xs = jnp.sort(x, axis=1)
    h = jnp.concatenate([xs, t], axis=1)
    h1 = jnp.tanh(jnp.dot(h, w1.T, precision=hp) + b1.T)
    e = jnp.tanh(jnp.dot(h1, w2.T, precision=hp) + b2.T)
    e = jnp.tanh(jnp.dot(e, w3.T, precision=hp) + b3.T)
    h2 = e + h1
    o = jnp.dot(jnp.tanh(h2), w4.T, precision=hp) + b4.T
    return jnp.take_along_axis(o, idx, axis=1)


if __name__ == "__main__":
    key = jax.random.PRNGKey(0)
    kp, kx, ky = jax.random.split(key, 3)

    # input_dim=3 (x0, x1, t), hid_dim=32, output_dim=2 as implied by forward()
    params = init_params(kp, input_dim=3, hid_dim=32, output_dim=2)

    # Small shape: single-block path (N padded to one 128-lane tile).
    inp = jax.random.normal(kx, (64, 3), dtype=jnp.float32)
    out = nn_new_forward(inp, params)
    jax.block_until_ready(out)
    ref = reference_forward(inp, params)
    assert out.shape == (64, 2)
    assert jnp.allclose(out, ref, atol=2e-4, rtol=2e-4), (
        float(jnp.max(jnp.abs(out - ref))))

    # Non-multiple batch size: exercises padding + multi-step grid.
    inp2 = jax.random.normal(ky, (300, 3), dtype=jnp.float32)
    out2 = nn_new_forward(inp2, params, tile_n=128)
    jax.block_until_ready(out2)
    ref2 = reference_forward(inp2, params)
    assert out2.shape == (300, 2)
    assert jnp.allclose(out2, ref2, atol=2e-4, rtol=2e-4), (
        float(jnp.max(jnp.abs(out2 - ref2))))

    print("KERNEL_OK")
</pallas_src>

<mosaic_0001>
module attributes {stable_mosaic.version = 11 : i64} {
  func.func @nn_new_kernel(%arg0: i32, %arg1: memref<3x128xf32, #tpu.memory_space<vmem>>, %arg2: memref<32x3xf32, #tpu.memory_space<vmem>>, %arg3: memref<32x1xf32, #tpu.memory_space<vmem>>, %arg4: memref<32x32xf32, #tpu.memory_space<vmem>>, %arg5: memref<32x1xf32, #tpu.memory_space<vmem>>, %arg6: memref<32x32xf32, #tpu.memory_space<vmem>>, %arg7: memref<32x1xf32, #tpu.memory_space<vmem>>, %arg8: memref<2x32xf32, #tpu.memory_space<vmem>>, %arg9: memref<2x1xf32, #tpu.memory_space<vmem>>, %arg10: memref<2x128xf32, #tpu.memory_space<vmem>>) attributes {dimension_semantics = [#tpu.dimension_semantics<parallel>], iteration_bounds = array<i64: 1>, scalar_prefetch = 0 : i64, scratch_operands = 0 : i64, tpu.core_type = #tpu.core_type<tc>, window_params = [{transform_indices = @transform_0, window_bounds = array<i64: 3, 128>}, {pipeline_mode = #tpu.pipeline_mode<synchronous>, transform_indices = @transform_1, window_bounds = array<i64: 32, 3>}, {pipeline_mode = #tpu.pipeline_mode<synchronous>, transform_indices = @transform_2, window_bounds = array<i64: 32, 1>}, {pipeline_mode = #tpu.pipeline_mode<synchronous>, transform_indices = @transform_3, window_bounds = array<i64: 32, 32>}, {pipeline_mode = #tpu.pipeline_mode<synchronous>, transform_indices = @transform_4, window_bounds = array<i64: 32, 1>}, {pipeline_mode = #tpu.pipeline_mode<synchronous>, transform_indices = @transform_5, window_bounds = array<i64: 32, 32>}, {pipeline_mode = #tpu.pipeline_mode<synchronous>, transform_indices = @transform_6, window_bounds = array<i64: 32, 1>}, {pipeline_mode = #tpu.pipeline_mode<synchronous>, transform_indices = @transform_7, window_bounds = array<i64: 2, 32>}, {pipeline_mode = #tpu.pipeline_mode<synchronous>, transform_indices = @transform_8, window_bounds = array<i64: 2, 1>}, {transform_indices = @transform_9, window_bounds = array<i64: 2, 128>}]} {
    %c0 = arith.constant 0 : index
    %c0_0 = arith.constant 0 : index
    %0 = vector.load %arg1[%c0, %c0_0] : memref<3x128xf32, #tpu.memory_space<vmem>>, vector<3x128xf32>
    %1 = vector.extract_strided_slice %0 {offsets = [0, 0], sizes = [1, 128], strides = [1, 1]} : vector<3x128xf32> to vector<1x128xf32>
    %2 = vector.extract_strided_slice %0 {offsets = [1, 0], sizes = [1, 128], strides = [1, 1]} : vector<3x128xf32> to vector<1x128xf32>
    %3 = vector.extract_strided_slice %0 {offsets = [2, 0], sizes = [1, 128], strides = [1, 1]} : vector<3x128xf32> to vector<1x128xf32>
    %4 = arith.cmpf ogt, %1, %2 : vector<1x128xf32>
    %5 = arith.minimumf %1, %2 : vector<1x128xf32>
    %6 = arith.maximumf %1, %2 : vector<1x128xf32>
    %7 = tpu.concatenate %5, %6, %3 in 0 : vector<1x128xf32>, vector<1x128xf32>, vector<1x128xf32> -> vector<3x128xf32>
    %c0_1 = arith.constant 0 : index
    %c0_2 = arith.constant 0 : index
    %8 = vector.load %arg3[%c0_1, %c0_2] : memref<32x1xf32, #tpu.memory_space<vmem>>, vector<32x1xf32>
    %c0_3 = arith.constant 0 : index
    %c0_4 = arith.constant 0 : index
    %9 = vector.load %arg5[%c0_3, %c0_4] : memref<32x1xf32, #tpu.memory_space<vmem>>, vector<32x1xf32>
    %c0_5 = arith.constant 0 : index
    %c0_6 = arith.constant 0 : index
    %10 = vector.load %arg7[%c0_5, %c0_6] : memref<32x1xf32, #tpu.memory_space<vmem>>, vector<32x1xf32>
    %c0_7 = arith.constant 0 : index
    %c0_8 = arith.constant 0 : index
    %11 = vector.load %arg9[%c0_7, %c0_8] : memref<2x1xf32, #tpu.memory_space<vmem>>, vector<2x1xf32>
    %c0_9 = arith.constant 0 : index
    %c0_10 = arith.constant 0 : index
    %12 = vector.load %arg2[%c0_9, %c0_10] : memref<32x3xf32, #tpu.memory_space<vmem>>, vector<32x3xf32>
    %cst = arith.constant dense<0.000000e+00> : vector<32x128xf32>
    %13 = tpu.matmul %12, %7, %cst {dimension_numbers = #tpu.dot_dimension_numbers<[1], [0], [0], [1], [0, 0, 1, 1], [], []>} : vector<32x3xf32>, vector<3x128xf32>, vector<32x128xf32> -> vector<32x128xf32>
    %14 = vector.broadcast %8 : vector<32x1xf32> to vector<32x128xf32>
    %15 = arith.addf %13, %14 : vector<32x128xf32>
    %16 = math.tanh %15 : vector<32x128xf32>
    %c0_11 = arith.constant 0 : index
    %c0_12 = arith.constant 0 : index
    %17 = vector.load %arg4[%c0_11, %c0_12] : memref<32x32xf32, #tpu.memory_space<vmem>>, vector<32x32xf32>
    %cst_13 = arith.constant dense<0.000000e+00> : vector<32x128xf32>
    %18 = tpu.matmul %17, %16, %cst_13 {dimension_numbers = #tpu.dot_dimension_numbers<[1], [0], [0], [1], [0, 0, 1, 1], [], []>} : vector<32x32xf32>, vector<32x128xf32>, vector<32x128xf32> -> vector<32x128xf32>
    %19 = vector.broadcast %9 : vector<32x1xf32> to vector<32x128xf32>
    %20 = arith.addf %18, %19 : vector<32x128xf32>
    %21 = math.tanh %20 : vector<32x128xf32>
    %c0_14 = arith.constant 0 : index
    %c0_15 = arith.constant 0 : index
    %22 = vector.load %arg6[%c0_14, %c0_15] : memref<32x32xf32, #tpu.memory_space<vmem>>, vector<32x32xf32>
    %cst_16 = arith.constant dense<0.000000e+00> : vector<32x128xf32>
    %23 = tpu.matmul %22, %21, %cst_16 {dimension_numbers = #tpu.dot_dimension_numbers<[1], [0], [0], [1], [0, 0, 1, 1], [], []>} : vector<32x32xf32>, vector<32x128xf32>, vector<32x128xf32> -> vector<32x128xf32>
    %24 = vector.broadcast %10 : vector<32x1xf32> to vector<32x128xf32>
    %25 = arith.addf %23, %24 : vector<32x128xf32>
    %26 = math.tanh %25 : vector<32x128xf32>
    %27 = arith.addf %26, %16 : vector<32x128xf32>
    %c0_17 = arith.constant 0 : index
    %c0_18 = arith.constant 0 : index
    %28 = vector.load %arg8[%c0_17, %c0_18] : memref<2x32xf32, #tpu.memory_space<vmem>>, vector<2x32xf32>
    %29 = math.tanh %27 : vector<32x128xf32>
    %cst_19 = arith.constant dense<0.000000e+00> : vector<2x128xf32>
    %30 = tpu.matmul %28, %29, %cst_19 {dimension_numbers = #tpu.dot_dimension_numbers<[1], [0], [0], [1], [0, 0, 1, 1], [], []>} : vector<2x32xf32>, vector<32x128xf32>, vector<2x128xf32> -> vector<2x128xf32>
    %31 = vector.broadcast %11 : vector<2x1xf32> to vector<2x128xf32>
    %32 = arith.addf %30, %31 : vector<2x128xf32>
    %33 = vector.extract_strided_slice %32 {offsets = [0, 0], sizes = [1, 128], strides = [1, 1]} : vector<2x128xf32> to vector<1x128xf32>
    %34 = vector.extract_strided_slice %32 {offsets = [1, 0], sizes = [1, 128], strides = [1, 1]} : vector<2x128xf32> to vector<1x128xf32>
    %35 = arith.select %4, %34, %33 : vector<1x128xi1>, vector<1x128xf32>
    %36 = arith.select %4, %33, %34 : vector<1x128xi1>, vector<1x128xf32>
    %37 = tpu.concatenate %35, %36 in 0 : vector<1x128xf32>, vector<1x128xf32> -> vector<2x128xf32>
    %c0_20 = arith.constant 0 : index
    %c0_21 = arith.constant 0 : index
    %38 = vector.load %arg10[%c0_20, %c0_21] : memref<2x128xf32, #tpu.memory_space<vmem>>, vector<2x128xf32>
    tpu.vector_store %arg10[%c0_20, %c0_21], %37 {strides = array<i32>} : memref<2x128xf32, #tpu.memory_space<vmem>>, vector<2x128xf32>,
    return
  }
  func.func @transform_0(%arg0: i32) -> (i32, i32) {
    %c0_i32 = arith.constant 0 : i32
    %c0_i32_0 = arith.constant 0 : i32
    return %c0_i32, %arg0 : i32, i32
  }
  func.func @transform_1(%arg0: i32) -> (i32, i32) {
    %c0_i32 = arith.constant 0 : i32
    %c0_i32_0 = arith.constant 0 : i32
    %c0_i32_1 = arith.constant 0 : i32
    return %c0_i32, %c0_i32_0 : i32, i32
  }
  func.func @transform_2(%arg0: i32) -> (i32, i32) {
    %c0_i32 = arith.constant 0 : i32
    %c0_i32_0 = arith.constant 0 : i32
    %c0_i32_1 = arith.constant 0 : i32
    return %c0_i32, %c0_i32_0 : i32, i32
  }
  func.func @transform_3(%arg0: i32) -> (i32, i32) {
    %c0_i32 = arith.constant 0 : i32
    %c0_i32_0 = arith.constant 0 : i32
    %c0_i32_1 = arith.constant 0 : i32
    return %c0_i32, %c0_i32_0 : i32, i32
  }
  func.func @transform_4(%arg0: i32) -> (i32, i32) {
    %c0_i32 = arith.constant 0 : i32
    %c0_i32_0 = arith.constant 0 : i32
    %c0_i32_1 = arith.constant 0 : i32
    return %c0_i32, %c0_i32_0 : i32, i32
  }
  func.func @transform_5(%arg0: i32) -> (i32, i32) {
    %c0_i32 = arith.constant 0 : i32
    %c0_i32_0 = arith.constant 0 : i32
    %c0_i32_1 = arith.constant 0 : i32
    return %c0_i32, %c0_i32_0 : i32, i32
  }
  func.func @transform_6(%arg0: i32) -> (i32, i32) {
    %c0_i32 = arith.constant 0 : i32
    %c0_i32_0 = arith.constant 0 : i32
    %c0_i32_1 = arith.constant 0 : i32
    return %c0_i32, %c0_i32_0 : i32, i32
  }
  func.func @transform_7(%arg0: i32) -> (i32, i32) {
    %c0_i32 = arith.constant 0 : i32
    %c0_i32_0 = arith.constant 0 : i32
    %c0_i32_1 = arith.constant 0 : i32
    return %c0_i32, %c0_i32_0 : i32, i32
  }
  func.func @transform_8(%arg0: i32) -> (i32, i32) {
    %c0_i32 = arith.constant 0 : i32
    %c0_i32_0 = arith.constant 0 : i32
    %c0_i32_1 = arith.constant 0 : i32
    return %c0_i32, %c0_i32_0 : i32, i32
  }
  func.func @transform_9(%arg0: i32) -> (i32, i32) {
    %c0_i32 = arith.constant 0 : i32
    %c0_i32_0 = arith.constant 0 : i32
    return %c0_i32, %arg0 : i32, i32
  }
}

</mosaic_0001>

<bundles_post_ra>
// kernel: tpu_custom_call.1
= control target key start
LH: loop header
LB: loop body
LE: loop exit
PB: predicated region body
PF: predicated region fallthrough
CT: control target
= control target key end

     0   :  { %14 = vsyncpa [#allocation3], 0  ;;  %s1311_s0 = inlined_call_operand.hbm [shape: f32[3,128], index: 0, kind: input, shape index: {}]   ;;  %s1312_s1 = inlined_call_operand.hbm [shape: f32[32,3], index: 1, kind: input, shape index: {}]   ;;  %s1313_s2 = inlined_call_operand.hbm [shape: f32[32,1], index: 2, kind: input, shape index: {}]   ;;  %s1314_s3 = inlined_call_operand.hbm [shape: f32[32,32], index: 3, kind: input, shape index: {}]   ;;  %s1315_s4 = inlined_call_operand.hbm [shape: f32[32,1], index: 4, kind: input, shape index: {}]   ;;  %s1316_s5 = inlined_call_operand.hbm [shape: f32[32,32], index: 5, kind: input, shape index: {}]   ;;  %s1317_s6 = inlined_call_operand.hbm [shape: f32[32,1], index: 6, kind: input, shape index: {}]   ;;  %s1318_s7 = inlined_call_operand.hbm [shape: f32[2,32], index: 7, kind: input, shape index: {}]   ;;  %s1319_s8 = inlined_call_operand.hbm [shape: f32[2,1], index: 8, kind: input, shape index: {}]   ;;  %s1320_s9 = inlined_call_operand.hbm [shape: f32[2,128], index: 9, kind: output, shape index: {}]  }
   0x1   :  { %15 = vsyncpa [#allocation6], 0 }
   0x2   :  { %16 = vsyncpa [#allocation9], 0 }
   0x3   :  { %17 = vsyncpa [#allocation12], 0 }
   0x4   :  { %18 = vsyncpa [#allocation15], 0 }
   0x5   :  { %19 = vsyncpa [#allocation4], 0  ;;  %s1064_s30 = smov [#allocation5]   ;;  %s832_s13 = scalar_lea.hbm %s1312_s1, 512 }
   0x6   :  { %s35_s10 = sshll.u32 %s1064_s30, 4  ;;  %p833_p0 = scmp.ne.s32.totalorder %s1312_s1, %s832_s13  ;;  %s36_s10 = int_to_ptr.vmem [resolvable:$true] %s35_s10 }
   0x7   :  { %p836_p1 = scmp.lt.u32.totalorder %s832_s13, %s1312_s1 }
   0x9   :  { %p838_p2 = pnand %p836_p1, %p833_p0 }
   0xb   :  { %841 = shalt.err (!%p838_p2)
}
   0xc   :  { %s842_s18 = scalar_lea.vmem %s36_s10, 512  ;;  %p847_p4 = scmp.lt.s32.totalorder %s36_s10, %s36_s10 }
   0xd   :  { %p843_p3 = scmp.ne.s32.totalorder %s36_s10, %s842_s18  ;;  %p848_p5 = scmp.lt.s32.totalorder %s842_s18, %s842_s18 }
   0xf   :  { %p849_p6 = por %p848_p5, %p847_p4 }
  0x11   :  { %p850_p7 = pnand %p849_p6, %p843_p3 }
  0x13   :  { %853 = shalt.err (!%p850_p7)
}
  0x14   :  { %s1065_s19 = smov 128   ;;  %s1066_s20 = smov 8  }
  0x15   :  { %41 = dma.hbm_to_vmem [thread:$0]  %s1312_s1, 512, %s36_s10, [#allocation6], %s1065_s19, %s1065_s19, %s1066_s20  }
  0x16   :  { %s1067_s23 = smov [#allocation8]   ;;  %s1068_s25 = smov [#allocation11]  }
  0x17   :  { %s59_s24 = sshll.u32 %s1067_s23, 4  ;;  %s83_s26 = sshll.u32 %s1068_s25, 4  ;;  %s60_s24 = int_to_ptr.vmem [resolvable:$true] %s59_s24  ;;  %s84_s26 = int_to_ptr.vmem [resolvable:$true] %s83_s26 }
  0x18   :  { %s854_s29 = scalar_lea.hbm %s1314_s3, 512 }
  0x19   :  { %p855_p8 = scmp.ne.s32.totalorder %s1314_s3, %s854_s29  ;;  %p858_p9 = scmp.lt.u32.totalorder %s854_s29, %s1314_s3 }
  0x1b   :  { %p860_p10 = pnand %p858_p9, %p855_p8 }
  0x1d   :  { %863 = shalt.err (!%p860_p10)
}
  0x1e   :  { %s864_s1 = scalar_lea.vmem %s60_s24, 512  ;;  %p869_p12 = scmp.lt.s32.totalorder %s60_s24, %s60_s24 }
  0x1f   :  { %p865_p11 = scmp.ne.s32.totalorder %s60_s24, %s864_s1  ;;  %p870_p13 = scmp.lt.s32.totalorder %s864_s1, %s864_s1 }
  0x21   :  { %p871_p0 = por %p870_p13, %p869_p12 }
  0x23   :  { %p872_p1 = pnand %p871_p0, %p865_p11 }
  0x25   :  { %875 = shalt.err (!%p872_p1)
}
  0x26   :  { %65 = dma.hbm_to_vmem [thread:$0]  %s1314_s3, 512, %s60_s24, [#allocation9], %s1065_s19, %s1065_s19, %s1066_s20  }
  0x27   :  { %s876_s17 = scalar_lea.hbm %s1316_s5, 512 }
  0x28   :  { %p877_p2 = scmp.ne.s32.totalorder %s1316_s5, %s876_s17  ;;  %p880_p3 = scmp.lt.u32.totalorder %s876_s17, %s1316_s5 }
  0x2a   :  { %p882_p4 = pnand %p880_p3, %p877_p2 }
  0x2c   :  { %885 = shalt.err (!%p882_p4)
}
  0x2d   :  { %s886_s25 = scalar_lea.vmem %s84_s26, 512  ;;  %p891_p6 = scmp.lt.s32.totalorder %s84_s26, %s84_s26 }
  0x2e   :  { %p887_p5 = scmp.ne.s32.totalorder %s84_s26, %s886_s25  ;;  %p892_p7 = scmp.lt.s32.totalorder %s886_s25, %s886_s25 }
  0x30   :  { %p893_p8 = por %p892_p7, %p891_p6 }
  0x32   :  { %p894_p9 = pnand %p893_p8, %p887_p5 }
  0x34   :  { %897 = shalt.err (!%p894_p9)
}
  0x35   :  { %89 = dma.hbm_to_vmem [thread:$0]  %s1316_s5, 512, %s84_s26, [#allocation12], %s1065_s19, %s1065_s19, %s1066_s20  }
  0x36   :  { %s1069_s27 = smov [#allocation14]   ;;  %s1070_s29 = smov [#allocation2]  }
  0x37   :  { %s108_s28 = sshll.u32 %s1069_s27, 4  ;;  %s26_s30 = sshll.u32 %s1070_s29, 4  ;;  %s109_s28 = int_to_ptr.vmem [resolvable:$true] %s108_s28  ;;  %s27_s30 = int_to_ptr.vmem [resolvable:$true] %s26_s30 }
  0x38   :  { %s898_s13 = scalar_lea.hbm %s1318_s7, 32 }
  0x39   :  { %p899_p10 = scmp.ne.s32.totalorder %s1318_s7, %s898_s13  ;;  %p902_p11 = scmp.lt.u32.totalorder %s898_s13, %s1318_s7 }
  0x3b   :  { %p904_p12 = pnand %p902_p11, %p899_p10 }
  0x3d   :  { %907 = shalt.err (!%p904_p12)
}
  0x3e   :  { %s908_s5 = scalar_lea.vmem %s109_s28, 32  ;;  %p913_p0 = scmp.lt.s32.totalorder %s109_s28, %s109_s28 }
  0x3f   :  { %p909_p13 = scmp.ne.s32.totalorder %s109_s28, %s908_s5  ;;  %p914_p1 = scmp.lt.s32.totalorder %s908_s5, %s908_s5 }
  0x41   :  { %p915_p2 = por %p914_p1, %p913_p0 }
  0x43   :  { %p916_p3 = pnand %p915_p2, %p909_p13 }
  0x45   :  { %919 = shalt.err (!%p916_p3)
}
  0x46   :  { %111 = dma.hbm_to_vmem [thread:$0]  %s1318_s7, 32, %s109_s28, [#allocation15]  }
  0x47   :  { %s920_s21 = scalar_lea.hbm %s1311_s0, 64 }
  0x48   :  { %p921_p4 = scmp.ne.s32.totalorder %s1311_s0, %s920_s21  ;;  %p924_p5 = scmp.lt.u32.totalorder %s920_s21, %s1311_s0 }
  0x4a   :  { %p926_p6 = pnand %p924_p5, %p921_p4 }
  0x4c   :  { %929 = shalt.err (!%p926_p6)
}
  0x4d   :  { %s930_s24 = scalar_lea.vmem %s27_s30, 64  ;;  %p935_p8 = scmp.lt.s32.totalorder %s27_s30, %s27_s30 }
  0x4e   :  { %p931_p7 = scmp.ne.s32.totalorder %s27_s30, %s930_s24  ;;  %p936_p9 = scmp.lt.s32.totalorder %s930_s24, %s930_s24 }
  0x50   :  { %p937_p10 = por %p936_p9, %p935_p8 }
  0x52   :  { %p938_p11 = pnand %p937_p10, %p931_p7 }
  0x54   :  { %941 = shalt.err (!%p938_p11)
}
  0x55   :  { %29 = dma.hbm_to_vmem [thread:$0]  %s1311_s0, 64, %s27_s30, [#allocation3]  }
  0x56   :  { %s1071_s28 = smov [#allocation7]   ;;  %s1072_s11 = smov [#allocation10]  }
  0x57   :  { %s47_s29 = sshll.u32 %s1071_s28, 4  ;;  %s71_s12 = sshll.u32 %s1072_s11, 4  ;;  %s48_s29 = int_to_ptr.vmem [resolvable:$true] %s47_s29  ;;  %s72_s12 = int_to_ptr.vmem [resolvable:$true] %s71_s12 }
  0x58   :  { %s942_s10 = scalar_lea.hbm %s1313_s2, 512 }
  0x59   :  { %p943_p12 = scmp.ne.s32.totalorder %s1313_s2, %s942_s10  ;;  %p946_p13 = scmp.lt.u32.totalorder %s942_s10, %s1313_s2 }
  0x5b   :  { %p948_p0 = pnand %p946_p13, %p943_p12 }
  0x5d   :  { %951 = shalt.err (!%p948_p0)
}
  0x5e   :  { %s952_s0 = scalar_lea.vmem %s48_s29, 512  ;;  %p957_p2 = scmp.lt.s32.totalorder %s48_s29, %s48_s29 }
  0x5f   :  { %p953_p1 = scmp.ne.s32.totalorder %s48_s29, %s952_s0  ;;  %p958_p3 = scmp.lt.s32.totalorder %s952_s0, %s952_s0 }
  0x61   :  { %p959_p4 = por %p958_p3, %p957_p2 }
  0x63   :  { %p960_p5 = pnand %p959_p4, %p953_p1 }
  0x65   :  { %963 = shalt.err (!%p960_p5)
}
  0x66   :  { %53 = dma.hbm_to_vmem [thread:$0]  %s1313_s2, 512, %s48_s29, [#allocation6], %s1065_s19, %s1065_s19, %s1066_s20  }
  0x67   :  { %s964_s21 = scalar_lea.hbm %s1315_s4, 512 }
  0x68   :  { %p965_p6 = scmp.ne.s32.totalorder %s1315_s4, %s964_s21  ;;  %p968_p7 = scmp.lt.u32.totalorder %s964_s21, %s1315_s4 }
  0x6a   :  { %p970_p8 = pnand %p968_p7, %p965_p6 }
  0x6c   :  { %973 = shalt.err (!%p970_p8)
}
  0x6d   :  { %s974_s24 = scalar_lea.vmem %s72_s12, 512  ;;  %p979_p10 = scmp.lt.s32.totalorder %s72_s12, %s72_s12 }
  0x6e   :  { %p975_p9 = scmp.ne.s32.totalorder %s72_s12, %s974_s24  ;;  %p980_p11 = scmp.lt.s32.totalorder %s974_s24, %s974_s24 }
  0x70   :  { %p981_p12 = por %p980_p11, %p979_p10 }
  0x72   :  { %p982_p13 = pnand %p981_p12, %p975_p9 }
  0x74   :  { %985 = shalt.err (!%p982_p13)
}
  0x75   :  { %77 = dma.hbm_to_vmem [thread:$0]  %s1315_s4, 512, %s72_s12, [#allocation9], %s1065_s19, %s1065_s19, %s1066_s20  }
  0x76   :  { %s1073_s27 = smov [#allocation13]   ;;  %s1074_s29 = smov [#allocation16]  }
  0x77   :  { %s95_s28 = sshll.u32 %s1073_s27, 4  ;;  %s118_s11 = sshll.u32 %s1074_s29, 4  ;;  %s96_s28 = int_to_ptr.vmem [resolvable:$true] %s95_s28  ;;  %s119_s11 = int_to_ptr.vmem [resolvable:$true] %s118_s11 }
  0x78   :  { %s986_s10 = scalar_lea.hbm %s1317_s6, 512 }
  0x79   :  { %p987_p0 = scmp.ne.s32.totalorder %s1317_s6, %s986_s10  ;;  %p990_p1 = scmp.lt.u32.totalorder %s986_s10, %s1317_s6 }
  0x7b   :  { %p992_p2 = pnand %p990_p1, %p987_p0 }
  0x7d   :  { %995 = shalt.err (!%p992_p2)
}
  0x7e   :  { %s996_s4 = scalar_lea.vmem %s96_s28, 512  ;;  %p1001_p4 = scmp.lt.s32.totalorder %s96_s28, %s96_s28 }
  0x7f   :  { %p997_p3 = scmp.ne.s32.totalorder %s96_s28, %s996_s4  ;;  %p1002_p5 = scmp.lt.s32.totalorder %s996_s4, %s996_s4 }
  0x81   :  { %p1003_p6 = por %p1002_p5, %p1001_p4 }
  0x83   :  { %p1004_p7 = pnand %p1003_p6, %p997_p3 }
  0x85   :  { %1007 = shalt.err (!%p1004_p7)
}
  0x86   :  { %101 = dma.hbm_to_vmem [thread:$0]  %s1317_s6, 512, %s96_s28, [#allocation12], %s1065_s19, %s1065_s19, %s1066_s20  }
  0x87   :  { %s1008_s17 = scalar_lea.hbm %s1319_s8, 32 }
  0x88   :  { %p1009_p8 = scmp.ne.s32.totalorder %s1319_s8, %s1008_s17  ;;  %p1012_p9 = scmp.lt.u32.totalorder %s1008_s17, %s1319_s8 }
  0x8a   :  { %p1014_p10 = pnand %p1012_p9, %p1009_p8 }
  0x8c   :  { %1017 = shalt.err (!%p1014_p10)
}
  0x8d   :  { %s1018_s25 = scalar_lea.vmem %s119_s11, 32  ;;  %p1023_p12 = scmp.lt.s32.totalorder %s119_s11, %s119_s11 }
  0x8e   :  { %p1019_p11 = scmp.ne.s32.totalorder %s119_s11, %s1018_s25  ;;  %p1024_p13 = scmp.lt.s32.totalorder %s1018_s25, %s1018_s25 }
  0x90   :  { %p1025_p0 = por %p1024_p13, %p1023_p12 }
  0x92   :  { %p1026_p1 = pnand %p1025_p0, %p1019_p11 }
  0x94   :  { %1029 = shalt.err (!%p1026_p1)
}
  0x95   :  { %121 = dma.hbm_to_vmem [thread:$0]  %s1319_s8, 32, %s119_s11, [#allocation15]  }
  0x96   :  { %1052 = dma.done.wait [#allocation3], 64  }
  0x97   :  { %1053 = vsyncadd [#allocation3], 4294967232 }
  0x98   :  { %1054 = dma.done.wait [#allocation6], 1024  }
  0x99   :  { %1055 = vsyncadd [#allocation6], 4294966272 }
  0x9a   :  { %1056 = dma.done.wait [#allocation9], 1024  }
  0x9b   :  { %1057 = vsyncadd [#allocation9], 4294966272 }
  0x9c   :  { %1058 = dma.done.wait [#allocation12], 1024  }
  0x9d   :  { %1059 = vsyncadd [#allocation12], 4294966272 }
  0x9e   :  { %1060 = dma.done.wait [#allocation15], 64  }
  0x9f   :  { %1061 = vsyncadd [#allocation15], 4294967232  ;;  %v1075_v0 = vmov 0   ;;  %vm200_vm0 = vcmask 23552   ;;  %v1256_v1 = vld [vmem:[#allocation2] sm:$0x7] }
  0xa0   :  { %798 = vset.pattern.permute.xlu0 %v1075_v0  ;;  %799 = vset.pattern.permute.xlu1 %v1075_v0  ;;  %v176_v2 = vld [vmem:[#allocation5] sm:$0xff]  ;;  %v1259_v3 = vrot.slane %v1256_v1, 1  ;;  %v165_v5 = vld [vmem:[#allocation7 + $0x10] sm:$0xff]  ;;  %v164_v8 = vld [vmem:[#allocation7 + $0x8] sm:$0xff]  ;;  %vm159_vm1 = vcmask 1040384   ;;  %vm161_vm2 = vcmask 1041408  }
  0xa1   :  { %715 = vmatprep.mubr.msk.f32.mxu0 %vm200_vm0, %v176_v2  ;;  %v163_v4 = vld [vmem:[#allocation7] sm:$0xff]  ;;  %192 = vperm.xlu1 %799, %v165_v5   ;;  %v166_v9 = vld [vmem:[#allocation7 + $0x18] sm:$0xff]  ;;  %vm213_vm3 = vcmask 1042432   ;;  %v177_v14 = vld [vmem:[#allocation5 + $0x8] sm:$0xff]  ;;  %vm330_vm4 = vcmask 261120   ;;  %vm1077_vm5 = vmmov 0  }
  0xa2   :  { %182 = vperm.xlu0 %798, %v163_v4   ;;  %v154_v6 = vmin.f32 %v1256_v1, %v1259_v3  ;;  %v155_v7 = vmax.f32 %v1256_v1, %v1259_v3  ;;  %v167_v12 = vld [vmem:[#allocation10] sm:$0xff]  ;;  %v168_v15 = vld [vmem:[#allocation10 + $0x8] sm:$0xff]  ;;  %v178_v16 = vld [vmem:[#allocation5 + $0x10] sm:$0xff]  ;;  %vm153_vm6 = vcmp.gt.f32.partialorder %v1256_v1, %v1259_v3  ;;  %s1079_s8 = smov [#allocation17]  }
  0xa3   :  { %v169_v17 = vld [vmem:[#allocation10 + $0x10] sm:$0xff]  ;;  %v179_v18 = vld [vmem:[#allocation5 + $0x18] sm:$0xff]  ;;  %v171_v20 = vld [vmem:[#allocation13] sm:$0xff]  ;;  %s660_s20 = sshll.u32 %s1079_s8, 4  ;;  %s661_s20 = int_to_ptr.vmem [resolvable:$true] %s660_s20 }
  0xa4   :  { %v157_v10 = vrot.slane %v155_v7, 7  ;;  %v170_v19 = vld [vmem:[#allocation10 + $0x18] sm:$0xff]  ;;  %v172_v21 = vld [vmem:[#allocation13 + $0x8] sm:$0xff]  ;;  %v173_v22 = vld [vmem:[#allocation13 + $0x10] sm:$0xff]  ;;  %v1076_v7 = vmov 0.0|0.0   ;;  %s1030_s3 = scalar_lea.vmem %s661_s20, 32  ;;  %p1035_p3 = scmp.lt.s32.totalorder %s661_s20, %s661_s20 }
  0xa5   :  { %197 = vperm.xlu1 %799, %v166_v9   ;;  %v174_v23 = vld [vmem:[#allocation13 + $0x18] sm:$0xff]  ;;  %v175_v24 = vld [vmem:[#allocation16] sm:$0x3]  ;;  %v307_v44 = vld [vmem:[#allocation8 + $0x8] sm:$0xff]  ;;  %p1031_p2 = scmp.ne.s32.totalorder %s661_s20, %s1030_s3  ;;  %p1036_p4 = scmp.lt.s32.totalorder %s1030_s3, %s1030_s3 }
  0xa6   :  { %187 = vperm.xlu0 %798, %v164_v8   ;;  %v160_v11 = vsel %vm159_vm1, %v154_v6, %v157_v10  ;;  %v306_v25 = vld [vmem:[#allocation8] sm:$0xff]  ;;  %v308_v45 = vld [vmem:[#allocation8 + $0x10] sm:$0xff]  ;;  %v309_v46 = vld [vmem:[#allocation8 + $0x18] sm:$0xff]  ;;  %v1078_v8 = vmov 0.0  }
  0xa7   :  { %v162_v13 = vsel %vm161_vm2, %v160_v11, %v1256_v1  ;;  %729 = vmatprep.mubr.msk.f32.mxu1 %vm330_vm4, %v306_v25  ;;  %v432_v47 = vld [vmem:[#allocation11] sm:$0xff]  ;;  %v433_v4 = vld [vmem:[#allocation11 + $0x8] sm:$0xff]  ;;  %v434_v5 = vld [vmem:[#allocation11 + $0x10] sm:$0xff]  ;;  %p1037_p5 = por %p1036_p4, %p1035_p3 }
  0xa8   :  { %713 = vmatprep.subr.msk.mxu0 %vm213_vm3, %v162_v13  ;;  %v435_v6 = vld [vmem:[#allocation11 + $0x18] sm:$0xff] }
  0xa9   :  { %714 = vmatpush3.msk.msra.mxu0 %vm213_vm3, %v162_v13  ;;  %317 = vperm.xlu1 %799, %v168_v15   ;;  %p1038_p6 = pnand %p1037_p5, %p1031_p2 }
  0xaa   :  { %312 = vperm.xlu0 %798, %v167_v12   ;;  %716 = vmatmul.mubr.msk.f32.vlgmr.msra.gmra.mrb[0].mxu0 %vm200_vm0, %v177_v14 }
  0xab   :  { %718 = vmatprep.mubr.msk.f32.mxu0 %vm200_vm0, %v178_v16 }
  0xad   :  { %327 = vperm.xlu1 %799, %v170_v19  }
  0xae   :  { %322 = vperm.xlu0 %798, %v169_v17   ;;  %719 = vmatmul.mubr.msk.f32.gmra.mrb[2].mxu0 %vm200_vm0, %v179_v18 }
  0xaf   :  { %743 = vmatprep.mubr.msk.f32.mxu0 %vm330_vm4, %v432_v47 }
  0xb1   :  { %443 = vperm.xlu1 %799, %v172_v21  }
  0xb2   :  { %438 = vperm.xlu0 %798, %v171_v20  }
  0xb5   :  { %453 = vperm.xlu1 %799, %v174_v23  }
  0xb6   :  { %448 = vperm.xlu0 %798, %v173_v22  }
  0xba   :  { %568 = vperm.xlu0 %798, %v175_v24  }
 0x120   :  { %v193_v27 = vpop.permute.xlu1 %192 }
 0x121   :  { %v183_v26 = vpop.permute.xlu0 %182 }
 0x124   :  { %v198_v33 = vpop.permute.xlu1 %197 }
 0x125   :  { %v188_v28 = vpop.permute.xlu0 %187 }
 0x128   :  { %v318_v48 = vpop.permute.xlu1 %317 }
 0x129   :  { %v313_v49 = vpop.permute.xlu0 %312 }
 0x12c   :  { %v328_v54 = vpop.permute.xlu1 %327 }
 0x12d   :  { %v323_v56 = vpop.permute.xlu0 %322 }
 0x130   :  { %v444_v9 = vpop.permute.xlu1 %443 }
 0x131   :  { %v439_v10 = vpop.permute.xlu0 %438 }
 0x134   :  { %v454_v15 = vpop.permute.xlu1 %453 }
 0x135   :  { %v449_v17 = vpop.permute.xlu0 %448 }
 0x17d   :  { %v717_v29 = vpop.f32.mrb[0].mxu0 }
 0x17e   :  { %v289_v30 = vadd.f32 %v717_v29, %v188_v28  ;;  %v283_v31 = vpop.f32.mrb[1].mxu0 }
 0x17f   :  { %v284_v32 = vadd.f32 %v283_v31, %v183_v26 }
 0x180   :  { %800 = vtanh.f32 %v289_v30 }
 0x181   :  { %802 = vtanh.f32 %v284_v32  ;;  %v720_v34 = vpop.f32.mrb[2].mxu0 }
 0x182   :  { %v299_v35 = vadd.f32 %v720_v34, %v198_v33  ;;  %v293_v36 = vpop.f32.mrb[3].mxu0 }
 0x183   :  { %v294_v37 = vadd.f32 %v293_v36, %v193_v27  ;;  %v569_v36 = vpop.permute.xlu0 %568 }
 0x184   :  { %804 = vtanh.f32 %v299_v35  ;;  %v561_v35 = vld [vmem:[#allocation14] sm:$0x3] }
 0x185   :  { %806 = vtanh.f32 %v294_v37 }
 0x18a   :  { %v1272_v38 = vpop.eup %800 }
 0x18b   :  { %v1274_v39 = vpop.eup %802 }
 0x18c   :  { %v760_v40 = vpack.c.bf16 %v1272_v38, %v1274_v39 }
 0x18e   :  { %v1278_v41 = vpop.eup %804  ;;  %761 = vmatprep.subr.bf16.mxu1 %v760_v40 }
 0x18f   :  { %v1280_v42 = vpop.eup %806  ;;  %763 = vmatpush3.bf16.msra.mxu1 %v760_v40 }
 0x190   :  { %v764_v43 = vpack.c.bf16 %v1278_v41, %v1280_v42 }
 0x192   :  { %765 = vmatprep.subr.bf16.mxu1 %v764_v43 }
 0x193   :  { %767 = vmatpush3.bf16.msra.mxu1 %v764_v43 }
 0x194   :  { %776 = vmatprep.subr.bf16.mxu1 %v1076_v7 }
 0x196   :  { %730 = vmatmul.mubr.msk.f32.vlgmr.msra.gmra.mrb[0].mxu1 %vm330_vm4, %v307_v44 }
 0x197   :  { %732 = vmatprep.mubr.msk.f32.mxu1 %vm330_vm4, %v308_v45 }
 0x19a   :  { %733 = vmatmul.mubr.msk.f32.gmra.mrb[2].mxu1 %vm330_vm4, %v309_v46 }
 0x19b   :  { %757 = vmatprep.mubr.msk.f32.mxu1 %vm1077_vm5, %v1078_v8 }
 0x269   :  { %v731_v50 = vpop.f32.mrb[0].mxu1 }
 0x26a   :  { %v415_v51 = vadd.f32 %v731_v50, %v318_v48  ;;  %v409_v52 = vpop.f32.mrb[1].mxu1 }
 0x26b   :  { %v410_v53 = vadd.f32 %v409_v52, %v313_v49 }
 0x26c   :  { %808 = vtanh.f32 %v415_v51 }
 0x26d   :  { %810 = vtanh.f32 %v410_v53  ;;  %v734_v55 = vpop.f32.mrb[2].mxu1 }
 0x26e   :  { %v425_v57 = vadd.f32 %v734_v55, %v328_v54  ;;  %v419_v58 = vpop.f32.mrb[3].mxu1 }
 0x26f   :  { %v420_v59 = vadd.f32 %v419_v58, %v323_v56 }
 0x270   :  { %812 = vtanh.f32 %v425_v57 }
 0x271   :  { %814 = vtanh.f32 %v420_v59 }
 0x276   :  { %v809_v60 = vpop.eup %808 }
 0x277   :  { %v811_v61 = vpop.eup %810 }
 0x278   :  { %v768_v62 = vpack.c.bf16 %v809_v60, %v811_v61 }
 0x27a   :  { %v813_v63 = vpop.eup %812  ;;  %769 = vmatprep.subr.bf16.mxu0 %v768_v62 }
 0x27b   :  { %v815_v0 = vpop.eup %814  ;;  %771 = vmatpush3.bf16.msra.mxu0 %v768_v62 }
 0x27c   :  { %v772_v2 = vpack.c.bf16 %v813_v63, %v815_v0 }
 0x27e   :  { %773 = vmatprep.subr.bf16.mxu0 %v772_v2 }
 0x27f   :  { %775 = vmatpush3.bf16.msra.mxu0 %v772_v2 }
 0x282   :  { %744 = vmatmul.mubr.msk.f32.vlgmr.msra.gmra.mrb[4].mxu0 %vm330_vm4, %v433_v4 }
 0x283   :  { %746 = vmatprep.mubr.msk.f32.mxu0 %vm330_vm4, %v434_v5 }
 0x286   :  { %747 = vmatmul.mubr.msk.f32.gmra.mrb[6].mxu0 %vm330_vm4, %v435_v6 }
 0x355   :  { %v745_v11 = vpop.f32.mrb[4].mxu0 }
 0x356   :  { %v540_v12 = vadd.f32 %v745_v11, %v444_v9  ;;  %v534_v13 = vpop.f32.mrb[5].mxu0 }
 0x357   :  { %v535_v14 = vadd.f32 %v534_v13, %v439_v10 }
 0x358   :  { %816 = vtanh.f32 %v540_v12 }
 0x359   :  { %818 = vtanh.f32 %v535_v14  ;;  %v748_v16 = vpop.f32.mrb[6].mxu0 }
 0x35a   :  { %v550_v18 = vadd.f32 %v748_v16, %v454_v15  ;;  %v544_v19 = vpop.f32.mrb[7].mxu0 }
 0x35b   :  { %v545_v20 = vadd.f32 %v544_v19, %v449_v17 }
 0x35c   :  { %820 = vtanh.f32 %v550_v18 }
 0x35d   :  { %822 = vtanh.f32 %v545_v20 }
 0x362   :  { %v817_v21 = vpop.eup %816 }
 0x363   :  { %v819_v22 = vpop.eup %818  ;;  %v558_v23 = vadd.f32 %v817_v21, %v1272_v38 }
 0x364   :  { %v557_v24 = vadd.f32 %v819_v22, %v1274_v39 }
 0x365   :  { %824 = vtanh.f32 %v558_v23 }
 0x366   :  { %v821_v25 = vpop.eup %820  ;;  %826 = vtanh.f32 %v557_v24 }
 0x367   :  { %v823_v26 = vpop.eup %822  ;;  %v560_v27 = vadd.f32 %v821_v25, %v1278_v41 }
 0x368   :  { %v559_v28 = vadd.f32 %v823_v26, %v1280_v42 }
 0x369   :  { %828 = vtanh.f32 %v560_v27 }
 0x36a   :  { %830 = vtanh.f32 %v559_v28 }
 0x36f   :  { %v825_v29 = vpop.eup %824 }
 0x370   :  { %v827_v30 = vpop.eup %826 }
 0x371   :  { %v777_v31 = vpack.c.bf16 %v825_v29, %v827_v30 }
 0x373   :  { %v829_v32 = vpop.eup %828  ;;  %778 = vmatpush3.bf16.msra.mxu1 %v777_v31 }
 0x374   :  { %v831_v33 = vpop.eup %830  ;;  %779 = vmatprep.subr.bf16.mxu1 %v1076_v7 }
 0x375   :  { %v780_v34 = vpack.c.bf16 %v829_v32, %v831_v33 }
 0x377   :  { %781 = vmatpush3.bf16.msra.mxu1 %v780_v34 }
 0x37a   :  { %758 = vmatmul.mubr.msk.f32.vlgmr.msra.gmra.mrb[4].mxu1 %vm330_vm4, %v561_v35 }
 0x44d   :  { %v640_v37 = vpop.f32.mrb[4].mxu1 }
 0x44e   :  { %v641_v38 = vadd.f32 %v640_v37, %v569_v36  ;;  %v759_v39 = vpop.f32.mrb[5].mxu1 }
 0x450   :  { %v645_v40 = vrot.slane %v641_v38, 1 }
 0x452   :  { %v648_v41 = vsel %vm153_vm6, %v641_v38, %v645_v40  ;;  %v647_v43 = vsel %vm153_vm6, %v645_v40, %v641_v38 }
 0x453   :  { %v650_v42 = vrot.slane %v648_v41, 7 }
 0x455   :  { %v652_v44 = vsel %vm159_vm1, %v647_v43, %v650_v42 }
 0x456   :  { %653 = vst [vmem:[#allocation17] sm:$0x3] %v652_v44 }
 0x457   :  { %1041 = shalt.err (!%p1038_p6)
}
 0x458   :  { %s1042_s7 = scalar_lea.hbm %s1320_s9, 32 }
 0x459   :  { %p1043_p7 = scmp.ne.s32.totalorder %s1320_s9, %s1042_s7  ;;  %p1046_p8 = scmp.lt.u32.totalorder %s1042_s7, %s1320_s9 }
 0x45b   :  { %p1048_p9 = pnand %p1046_p8, %p1043_p7 }
 0x45d   :  { %1051 = shalt.err (!%p1048_p9)
}
 0x45e   :  { %663 = dma.vmem_to_hbm [thread:$0]  %s661_s20, 32, %s1320_s9, [#allocation4]  }
 0x45f   :  { %1062 = dma.done.wait [#allocation4], 32  }
 0x460   :  { %1063 = vsyncadd [#allocation4], 4294967264 }
 0x461   :  { %667 = vsyncpa [#allocation3], 1 }
 0x462   :  { %668 = vsyncpa [#allocation6], 1 }
 0x463   :  { %669 = vsyncpa [#allocation9], 1 }
 0x464   :  { %670 = vsyncpa [#allocation12], 1 }
 0x465   :  { %671 = vsyncpa [#allocation15], 1 }
 0x466   :  { %672 = vsyncpa [#allocation4], 1 }

</bundles_post_ra>
